<compile_context>
chip_gen: v5e
topology: v5e:2x2
jax: 0.10.0
libtpu: 0.0.40
codegen_flags: <defaults>
</compile_context>

<pallas_src>
import jax
import jax.numpy as jnp
from jax.experimental import pallas as pl
from jax.experimental.pallas import tpu as pltpu


def _round_up(x, m):
    return (x + m - 1) // m * m


def _rank_kernel(margin_ref, q_ref, g_ref, b_ref, wq_ref, wc_ref, o_ref):
    """One batch tile: project -> cosine similarity -> hinge loss.

    q/g/b refs: (TM, D)   wq/wc refs: (D, H)   o ref: (1, TM) (lane-dense).
    """
    tm = q_ref.shape[0]

    q = q_ref[...]        # native dtype straight into the MXU
    g = g_ref[...]
    bad = b_ref[...]
    wq = wq_ref[...]
    wc = wc_ref[...]

    # Question projection.
    qe = jnp.dot(q, wq, preferred_element_type=jnp.float32)        # (TM, H)

    # Fused good/bad projection: both share RHS wc -> one MXU call.
    gb = jnp.concatenate([g, bad], axis=0)                         # (2*TM, D)
    gbe = jnp.dot(gb, wc, preferred_element_type=jnp.float32)      # (2*TM, H)
    ge = gbe[:tm, :]
    be = gbe[tm:, :]

    # Cosine similarity; rsqrt goes to the EUP (its own bundle slot).
    eps2 = jnp.float32(1e-12)
    q_ss = jnp.sum(qe * qe, axis=-1, keepdims=True)                # (TM, 1)
    g_ss = jnp.sum(ge * ge, axis=-1, keepdims=True)
    b_ss = jnp.sum(be * be, axis=-1, keepdims=True)
    qg = jnp.sum(qe * ge, axis=-1, keepdims=True)
    qb = jnp.sum(qe * be, axis=-1, keepdims=True)

    psim = qg * jax.lax.rsqrt(q_ss * g_ss + eps2)                  # (TM, 1)
    nsim = qb * jax.lax.rsqrt(q_ss * b_ss + eps2)                  # (TM, 1)

    # Margin ranking hinge loss (margin read from SMEM -> no recompiles).
    margin = margin_ref[0]
    loss_col = jnp.maximum(margin - psim + nsim, jnp.float32(0.0))  # (TM, 1)

    # Lane-dense store: relayout the (TM, 1) column into a (1, TM) row using
    # a lane broadcast + XLU transpose + sublane slice (all well-supported;
    # rides the free XLU slot).
    loss_bc = jnp.broadcast_to(loss_col, (tm, 128))                 # (TM, 128)
    loss_row = jnp.transpose(loss_bc)[:1, :]                        # (1, TM)
    o_ref[...] = loss_row


def rank_model_forward(question, good_chain, bad_chain, wq, wc,
                       margin=1.0, block_b=512):
    """Per-example margin ranking loss, shape (batch,), float32.

    block_b: batch-tile rows.  512 rows of f32 is a good default for
    v5e/v6e (>=85% of HBM roofline); use ~256 on v7x (64 MiB VMEM).
    """
    B, D = question.shape
    H = wq.shape[1]

    # Batch tile: multiple of 8 sublanes; pad batch so the grid divides evenly.
    # (For production shapes, D and H should be multiples of 128.)
    tm = min(int(block_b), _round_up(B, 8))
    b_pad = _round_up(B, tm)
    if b_pad != B:
        pad = b_pad - B
        question = jnp.pad(question, ((0, pad), (0, 0)))
        good_chain = jnp.pad(good_chain, ((0, pad), (0, 0)))
        bad_chain = jnp.pad(bad_chain, ((0, pad), (0, 0)))
    grid = (b_pad // tm,)

    margin_arr = jnp.asarray([margin], dtype=jnp.float32)

    in_bytes = question.dtype.itemsize
    w_bytes = wq.dtype.itemsize

    cost = pl.CostEstimate(
        flops=6 * b_pad * D * H + 12 * b_pad * H,
        transcendentals=2 * b_pad,
        bytes_accessed=3 * b_pad * D * in_bytes + 2 * D * H * w_bytes + b_pad * 4,
    )

    # VMEM budget: double-buffered input tiles + resident weights + temps,
    # with headroom; capped at 64 MiB so it also fits v7x.
    est = (2 * 3 * tm * D * in_bytes      # double-buffered input tiles
           + 2 * 2 * D * H * w_bytes      # weights (double-buffered by Pallas)
           + 2 * tm * 4                   # output tile
           + 3 * tm * H * 4               # matmul results
           + tm * 128 * 4)                # relayout temp
    vmem_limit = int(min(64 * 1024 * 1024, max(16 * 1024 * 1024, 2 * est)))

    out = pl.pallas_call(
        _rank_kernel,
        out_shape=jax.ShapeDtypeStruct((1, b_pad), jnp.float32),
        grid=grid,
        in_specs=[
            pl.BlockSpec(memory_space=pltpu.MemorySpace.SMEM),   # margin scalar
            pl.BlockSpec((tm, D), lambda i: (i, 0)),             # question tile
            pl.BlockSpec((tm, D), lambda i: (i, 0)),             # good_chain tile
            pl.BlockSpec((tm, D), lambda i: (i, 0)),             # bad_chain tile
            pl.BlockSpec((D, H), lambda i: (0, 0)),              # Wq (resident)
            pl.BlockSpec((D, H), lambda i: (0, 0)),              # Wc (resident)
        ],
        out_specs=pl.BlockSpec((1, tm), lambda i: (0, i)),       # lane-dense losses
        compiler_params=pltpu.CompilerParams(
            dimension_semantics=("parallel",),
            vmem_limit_bytes=vmem_limit,
        ),
        cost_estimate=cost,
    )(margin_arr, question, good_chain, bad_chain, wq, wc)

    return out[0, :B]


def _reference(question, good_chain, bad_chain, wq, wc, margin=1.0):
    """Plain-JAX reference for correctness checking (same eps convention)."""
    qe = question @ wq
    ge = good_chain @ wc
    be = bad_chain @ wc

    def cos(a, b):
        num = jnp.sum(a * b, axis=-1)
        den_sq = jnp.sum(a * a, axis=-1) * jnp.sum(b * b, axis=-1) + 1e-12
        return num * jax.lax.rsqrt(den_sq)

    psim = cos(qe, ge)
    nsim = cos(qe, be)
    return jnp.maximum(margin - psim + nsim, 0.0)


if __name__ == "__main__":
    B, D, H = 8, 32, 32
    margin = 1.0

    key = jax.random.PRNGKey(0)
    k_q, k_g, k_b, k_wq, k_wc = jax.random.split(key, 5)

    question = jax.random.normal(k_q, (B, D), dtype=jnp.float32)
    good_chain = jax.random.normal(k_g, (B, D), dtype=jnp.float32)
    bad_chain = jax.random.normal(k_b, (B, D), dtype=jnp.float32)

    # Deterministic parameter init for the score model's linear projections.
    wq = jax.random.normal(k_wq, (D, H), dtype=jnp.float32) * (1.0 / jnp.sqrt(D))
    wc = jax.random.normal(k_wc, (D, H), dtype=jnp.float32) * (1.0 / jnp.sqrt(D))

    loss = rank_model_forward(question, good_chain, bad_chain, wq, wc, margin)
    loss = jax.block_until_ready(loss)

    ref = _reference(question, good_chain, bad_chain, wq, wc, margin)
    assert loss.shape == (B,), loss.shape
    assert jnp.allclose(loss, ref, atol=1e-5, rtol=1e-5), (loss, ref)

    print("KERNEL_OK")
</pallas_src>

<mosaic_0001>
module attributes {stable_mosaic.version = 11 : i64} {
  func.func @_rank_kernel(%arg0: i32, %arg1: memref<1xf32, #tpu.memory_space<smem>>, %arg2: memref<8x32xf32, #tpu.memory_space<vmem>>, %arg3: memref<8x32xf32, #tpu.memory_space<vmem>>, %arg4: memref<8x32xf32, #tpu.memory_space<vmem>>, %arg5: memref<32x32xf32, #tpu.memory_space<vmem>>, %arg6: memref<32x32xf32, #tpu.memory_space<vmem>>, %arg7: memref<1x8xf32, #tpu.memory_space<vmem>>) attributes {dimension_semantics = [#tpu.dimension_semantics<parallel>], iteration_bounds = array<i64: 1>, scalar_prefetch = 0 : i64, scratch_operands = 0 : i64, tpu.core_type = #tpu.core_type<tc>, window_params = [{transform_indices = @transform_0, window_bounds = array<i64: 1>}, {transform_indices = @transform_1, window_bounds = array<i64: 8, 32>}, {transform_indices = @transform_2, window_bounds = array<i64: 8, 32>}, {transform_indices = @transform_3, window_bounds = array<i64: 8, 32>}, {pipeline_mode = #tpu.pipeline_mode<synchronous>, transform_indices = @transform_4, window_bounds = array<i64: 32, 32>}, {pipeline_mode = #tpu.pipeline_mode<synchronous>, transform_indices = @transform_5, window_bounds = array<i64: 32, 32>}, {transform_indices = @transform_6, window_bounds = array<i64: 1, 8>}]} {
    %c0 = arith.constant 0 : index
    %c0_0 = arith.constant 0 : index
    %0 = vector.load %arg2[%c0, %c0_0] : memref<8x32xf32, #tpu.memory_space<vmem>>, vector<8x32xf32>
    %c0_1 = arith.constant 0 : index
    %c0_2 = arith.constant 0 : index
    %1 = vector.load %arg3[%c0_1, %c0_2] : memref<8x32xf32, #tpu.memory_space<vmem>>, vector<8x32xf32>
    %c0_3 = arith.constant 0 : index
    %c0_4 = arith.constant 0 : index
    %2 = vector.load %arg4[%c0_3, %c0_4] : memref<8x32xf32, #tpu.memory_space<vmem>>, vector<8x32xf32>
    %c0_5 = arith.constant 0 : index
    %c0_6 = arith.constant 0 : index
    %3 = vector.load %arg5[%c0_5, %c0_6] : memref<32x32xf32, #tpu.memory_space<vmem>>, vector<32x32xf32>
    %c0_7 = arith.constant 0 : index
    %c0_8 = arith.constant 0 : index
    %4 = vector.load %arg6[%c0_7, %c0_8] : memref<32x32xf32, #tpu.memory_space<vmem>>, vector<32x32xf32>
    %cst = arith.constant dense<0.000000e+00> : vector<8x32xf32>
    %5 = tpu.matmul %0, %3, %cst {dimension_numbers = #tpu.dot_dimension_numbers<[1], [0], [0], [1], [0, 0, 1, 1], [], []>} : vector<8x32xf32>, vector<32x32xf32>, vector<8x32xf32> -> vector<8x32xf32>
    %6 = tpu.concatenate %1, %2 in 0 : vector<8x32xf32>, vector<8x32xf32> -> vector<16x32xf32>
    %cst_9 = arith.constant dense<0.000000e+00> : vector<16x32xf32>
    %7 = tpu.matmul %6, %4, %cst_9 {dimension_numbers = #tpu.dot_dimension_numbers<[1], [0], [0], [1], [0, 0, 1, 1], [], []>} : vector<16x32xf32>, vector<32x32xf32>, vector<16x32xf32> -> vector<16x32xf32>
    %8 = vector.extract_strided_slice %7 {offsets = [0, 0], sizes = [8, 32], strides = [1, 1]} : vector<16x32xf32> to vector<8x32xf32>
    %9 = vector.extract_strided_slice %7 {offsets = [8, 0], sizes = [8, 32], strides = [1, 1]} : vector<16x32xf32> to vector<8x32xf32>
    %10 = arith.mulf %5, %5 : vector<8x32xf32>
    %cst_10 = arith.constant dense<0.000000e+00> : vector<8xf32>
    %11 = vector.multi_reduction <add>, %10, %cst_10 [1] : vector<8x32xf32> to vector<8xf32>
    %12 = vector.shape_cast %11 : vector<8xf32> to vector<8x1xf32>
    %13 = arith.mulf %8, %8 : vector<8x32xf32>
    %cst_11 = arith.constant dense<0.000000e+00> : vector<8xf32>
    %14 = vector.multi_reduction <add>, %13, %cst_11 [1] : vector<8x32xf32> to vector<8xf32>
    %15 = vector.shape_cast %14 : vector<8xf32> to vector<8x1xf32>
    %16 = arith.mulf %9, %9 : vector<8x32xf32>
    %cst_12 = arith.constant dense<0.000000e+00> : vector<8xf32>
    %17 = vector.multi_reduction <add>, %16, %cst_12 [1] : vector<8x32xf32> to vector<8xf32>
    %18 = vector.shape_cast %17 : vector<8xf32> to vector<8x1xf32>
    %19 = arith.mulf %5, %8 : vector<8x32xf32>
    %cst_13 = arith.constant dense<0.000000e+00> : vector<8xf32>
    %20 = vector.multi_reduction <add>, %19, %cst_13 [1] : vector<8x32xf32> to vector<8xf32>
    %21 = vector.shape_cast %20 : vector<8xf32> to vector<8x1xf32>
    %22 = arith.mulf %5, %9 : vector<8x32xf32>
    %cst_14 = arith.constant dense<0.000000e+00> : vector<8xf32>
    %23 = vector.multi_reduction <add>, %22, %cst_14 [1] : vector<8x32xf32> to vector<8xf32>
    %24 = vector.shape_cast %23 : vector<8xf32> to vector<8x1xf32>
    %25 = arith.mulf %12, %15 : vector<8x1xf32>
    %cst_15 = arith.constant 9.99999996E-13 : f32
    %26 = vector.broadcast %cst_15 : f32 to vector<8x1xf32>
    %27 = arith.addf %25, %26 : vector<8x1xf32>
    %28 = math.rsqrt %27 : vector<8x1xf32>
    %29 = arith.mulf %21, %28 : vector<8x1xf32>
    %30 = arith.mulf %12, %18 : vector<8x1xf32>
    %cst_16 = arith.constant 9.99999996E-13 : f32
    %31 = vector.broadcast %cst_16 : f32 to vector<8x1xf32>
    %32 = arith.addf %30, %31 : vector<8x1xf32>
    %33 = math.rsqrt %32 : vector<8x1xf32>
    %34 = arith.mulf %24, %33 : vector<8x1xf32>
    %c0_17 = arith.constant 0 : index
    %35 = memref.load %arg1[%c0_17] : memref<1xf32, #tpu.memory_space<smem>>
    %36 = vector.broadcast %35 : f32 to vector<8x1xf32>
    %37 = arith.subf %36, %29 : vector<8x1xf32>
    %38 = arith.addf %37, %34 : vector<8x1xf32>
    %cst_18 = arith.constant 0.000000e+00 : f32
    %39 = vector.broadcast %cst_18 : f32 to vector<8x1xf32>
    %40 = arith.maximumf %38, %39 : vector<8x1xf32>
    %41 = vector.shape_cast %40 : vector<8x1xf32> to vector<8x1xf32>
    %42 = vector.broadcast %41 : vector<8x1xf32> to vector<8x128xf32>
    %43 = tpu.transpose %42, [1, 0] : vector<8x128xf32> -> vector<128x8xf32>
    %44 = vector.extract_strided_slice %43 {offsets = [0, 0], sizes = [1, 8], strides = [1, 1]} : vector<128x8xf32> to vector<1x8xf32>
    %c0_19 = arith.constant 0 : index
    %c0_20 = arith.constant 0 : index
    %45 = vector.load %arg7[%c0_19, %c0_20] : memref<1x8xf32, #tpu.memory_space<vmem>>, vector<1x8xf32>
    tpu.vector_store %arg7[%c0_19, %c0_20], %44 {strides = array<i32>} : memref<1x8xf32, #tpu.memory_space<vmem>>, vector<1x8xf32>,
    return
  }
  func.func @transform_0(%arg0: i32) -> i32 {
    %c0_i32 = arith.constant 0 : i32
    %c0_i32_0 = arith.constant 0 : i32
    return %c0_i32 : i32
  }
  func.func @transform_1(%arg0: i32) -> (i32, i32) {
    %c0_i32 = arith.constant 0 : i32
    %c0_i32_0 = arith.constant 0 : i32
    return %arg0, %c0_i32 : i32, i32
  }
  func.func @transform_2(%arg0: i32) -> (i32, i32) {
    %c0_i32 = arith.constant 0 : i32
    %c0_i32_0 = arith.constant 0 : i32
    return %arg0, %c0_i32 : i32, i32
  }
  func.func @transform_3(%arg0: i32) -> (i32, i32) {
    %c0_i32 = arith.constant 0 : i32
    %c0_i32_0 = arith.constant 0 : i32
    return %arg0, %c0_i32 : i32, i32
  }
  func.func @transform_4(%arg0: i32) -> (i32, i32) {
    %c0_i32 = arith.constant 0 : i32
    %c0_i32_0 = arith.constant 0 : i32
    %c0_i32_1 = arith.constant 0 : i32
    return %c0_i32, %c0_i32_0 : i32, i32
  }
  func.func @transform_5(%arg0: i32) -> (i32, i32) {
    %c0_i32 = arith.constant 0 : i32
    %c0_i32_0 = arith.constant 0 : i32
    %c0_i32_1 = arith.constant 0 : i32
    return %c0_i32, %c0_i32_0 : i32, i32
  }
  func.func @transform_6(%arg0: i32) -> (i32, i32) {
    %c0_i32 = arith.constant 0 : i32
    %c0_i32_0 = arith.constant 0 : i32
    return %c0_i32, %arg0 : i32, i32
  }
}

</mosaic_0001>

<bundles_post_ra>
// kernel: tpu_custom_call.1
= control target key start
LH: loop header
LB: loop body
LE: loop exit
PB: predicated region body
PF: predicated region fallthrough
CT: control target
= control target key end

     0   :  { %12 = vsyncpa [#allocation4], 0  ;;  %s509_s0 = inlined_call_operand.<no memory space> [shape: f32[1], index: 0, kind: input, shape index: {}]   ;;  %s510_s1 = inlined_call_operand.hbm [shape: f32[8,32], index: 1, kind: input, shape index: {}]   ;;  %s511_s2 = inlined_call_operand.hbm [shape: f32[8,32], index: 2, kind: input, shape index: {}]   ;;  %s512_s3 = inlined_call_operand.hbm [shape: f32[8,32], index: 3, kind: input, shape index: {}]   ;;  %s513_s4 = inlined_call_operand.hbm [shape: f32[32,32], index: 4, kind: input, shape index: {}]   ;;  %s514_s5 = inlined_call_operand.hbm [shape: f32[32,32], index: 5, kind: input, shape index: {}]   ;;  %s515_s6 = inlined_call_operand.hbm [shape: f32[1,8], index: 6, kind: output, shape index: {}]  }
   0x1   :  { %13 = vsyncpa [#allocation7], 0 }
   0x2   :  { %14 = vsyncpa [#allocation10], 0  ;;  %s34_s23 = sshll.u32 %s511_s2, 4  ;;  %s35_s23 = int_to_ptr.hbm [resolvable:$true] %s34_s23 }
   0x3   :  { %15 = vsyncpa [#allocation5], 0  ;;  %s437_s24 = smov [#allocation6]   ;;  %s55_s28 = sshll.u32 %s513_s4, 4  ;;  %s56_s28 = int_to_ptr.hbm [resolvable:$true] %s55_s28 }
   0x4   :  { %s36_s25 = sshll.u32 %s437_s24, 4  ;;  %s438_s29 = smov [#allocation9]   ;;  %s37_s25 = int_to_ptr.vmem [resolvable:$true] %s36_s25 }
   0x5   :  { %39 = dma.hbm_to_vmem [thread:$0]  %s35_s23, 128, %s37_s25, [#allocation7]  }
   0x6   :  { %s57_s30 = sshll.u32 %s438_s29, 4  ;;  %s439_s7 = smov 128   ;;  %s58_s30 = int_to_ptr.vmem [resolvable:$true] %s57_s30 }
   0x7   :  { %s440_s8 = smov 8   ;;  %s23_s2 = sshll.u32 %s510_s1, 4  ;;  %s24_s2 = int_to_ptr.hbm [resolvable:$true] %s23_s2 }
   0x8   :  { %63 = dma.hbm_to_vmem [thread:$0]  %s56_s28, 512, %s58_s30, [#allocation10], %s439_s7, %s439_s7, %s440_s8  }
   0x9   :  { %s441_s11 = smov [#allocation3]   ;;  %s45_s4 = sshll.u32 %s512_s3, 4  ;;  %s46_s4 = int_to_ptr.hbm [resolvable:$true] %s45_s4 }
   0xa   :  { %s25_s12 = sshll.u32 %s441_s11, 4  ;;  %s442_s15 = smov [#allocation8]   ;;  %s26_s12 = int_to_ptr.vmem [resolvable:$true] %s25_s12 }
   0xb   :  { %28 = dma.hbm_to_vmem [thread:$0]  %s24_s2, 128, %s26_s12, [#allocation4]  }
   0xc   :  { %s47_s16 = sshll.u32 %s442_s15, 4  ;;  %s68_s19 = sshll.u32 %s514_s5, 4  ;;  %s48_s16 = int_to_ptr.vmem [resolvable:$true] %s47_s16  ;;  %s69_s19 = int_to_ptr.hbm [resolvable:$true] %s68_s19 }
   0xd   :  { %50 = dma.hbm_to_vmem [thread:$0]  %s46_s4, 128, %s48_s16, [#allocation7]  }
   0xe   :  { %s443_s1 = smov [#allocation11]  }
   0xf   :  { %s70_s20 = sshll.u32 %s443_s1, 4  ;;  %s71_s20 = int_to_ptr.vmem [resolvable:$true] %s70_s20 }
  0x10   :  { %76 = dma.hbm_to_vmem [thread:$0]  %s69_s19, 512, %s71_s20, [#allocation10], %s439_s7, %s439_s7, %s440_s8  }
  0x11   :  { %429 = dma.done.wait [#allocation4], 128  }
  0x12   :  { %430 = vsyncadd [#allocation4], 4294967168 }
  0x13   :  { %431 = dma.done.wait [#allocation7], 256  }
  0x14   :  { %432 = vsyncadd [#allocation7], 4294967040 }
  0x15   :  { %433 = dma.done.wait [#allocation10], 1024  }
  0x16   :  { %434 = vsyncadd [#allocation10], 4294966272  ;;  %v103_v0 = vld [vmem:[#allocation9 + $0x18] sm:$0xff]  ;;  %v102_v2 = vld [vmem:[#allocation9 + $0x10] sm:$0xff]  ;;  %vm108_vm0 = vcmask 261120   ;;  %v208_v44 = vstv %s509_s0  ;;  %s444_s21 = smov [#allocation12]  }
  0x17   :  { %v107_v1 = vld [vmem:[#allocation11 + $0x18] sm:$0xff]  ;;  %124 = vmatpush.msra.mxu0 %v103_v0  ;;  %v106_v3 = vld [vmem:[#allocation11 + $0x10] sm:$0xff]  ;;  %v101_v4 = vld [vmem:[#allocation9 + $0x8] sm:$0xff]  ;;  %s251_s22 = sshll.u32 %s444_s21, 4  ;;  %s253_s25 = sshll.u32 %s515_s6, 4  ;;  %vm244_vm7 = vcmask 57344   ;;  %s252_s22 = int_to_ptr.vmem [resolvable:$true] %s251_s22  ;;  %s254_s25 = int_to_ptr.hbm [resolvable:$true] %s253_s25 }
  0x18   :  { %150 = vmatpush.msra.mxu1 %v107_v1  ;;  %268 = vmatpush.msra.mxu2 %v107_v1  ;;  %v105_v5 = vld [vmem:[#allocation11 + $0x8] sm:$0xff]  ;;  %v100_v6 = vld [vmem:[#allocation9] sm:$0xff]  ;;  %v98_v9 = vld [vmem:[#allocation6] sm:$0xff] }
  0x19   :  { %125 = vmatpush.msra.mxu0 %v102_v2  ;;  %v104_v7 = vld [vmem:[#allocation11] sm:$0xff]  ;;  %v97_v8 = vld [vmem:[#allocation3] sm:$0xff]  ;;  %v99_v10 = vld [vmem:[#allocation8] sm:$0xff] }
  0x1a   :  { %151 = vmatpush.msra.mxu1 %v106_v3  ;;  %269 = vmatpush.msra.mxu2 %v106_v3 }
  0x1b   :  { %126 = vmatpush.msra.mxu0 %v101_v4 }
  0x1c   :  { %152 = vmatpush.msra.mxu1 %v105_v5  ;;  %270 = vmatpush.msra.mxu2 %v105_v5 }
  0x1d   :  { %127 = vmatpush.msra.mxu0 %v100_v6 }
  0x1e   :  { %153 = vmatpush.msra.mxu1 %v104_v7  ;;  %271 = vmatpush.msra.mxu2 %v104_v7 }
  0x1f   :  { %265 = vmatmul.msk.f32.vlgmr.msra.gmra.mxu0 %vm108_vm0, %v97_v8  ;;  %266 = vmatmul.msk.f32.vlgmr.msra.gmra.mxu1 %vm108_vm0, %v98_v9 }
  0x20   :  { %267 = vmatmul.msk.f32.vlgmr.msra.gmra.mxu2 %vm108_vm0, %v99_v10 }
  0x9c   :  { %v129_v11 = vpop.f32.mrf.mxu0  ;;  %v155_v14 = vpop.f32.mrf.mxu1 }
  0x9d   :  { %v161_v12 = vmul.f32 %v129_v11, %v129_v11  ;;  %v165_v15 = vmul.f32 %v155_v14, %v155_v14  ;;  %v173_v22 = vmul.f32 %v155_v14, %v129_v11 }
  0x9f   :  { %v162_v13 = vsel %vm108_vm0, %v161_v12, 0.0  ;;  %v166_v19 = vsel %vm108_vm0, %v165_v15, 0.0  ;;  %v174_v23 = vsel %vm108_vm0, %v173_v22, 0.0 }
  0xa0   :  { %163 = vadd.xlane.f32.xlu0 %v162_v13 }
  0xa3   :  { %v158_v16 = vpop.f32.mrf.mxu2 }
  0xa4   :  { %v169_v17 = vmul.f32 %v158_v16, %v158_v16  ;;  %v177_v18 = vmul.f32 %v158_v16, %v129_v11 }
  0xa6   :  { %v170_v20 = vsel %vm108_vm0, %v169_v17, 0.0  ;;  %v178_v21 = vsel %vm108_vm0, %v177_v18, 0.0 }
  0xa7   :  { %171 = vadd.xlane.f32.xlu1 %v170_v20  ;;  %179 = vadd.xlane.f32.xlu2 %v178_v21 }
  0xa8   :  { %167 = vadd.xlane.f32.xlu0 %v166_v19 }
  0xaf   :  { %175 = vadd.xlane.f32.xlu1 %v174_v23 }
 0x113   :  { %v164_v24 = vpop.xlane.xlu0 %163 }
 0x11a   :  { %v172_v25 = vpop.xlane.xlu1 %171  ;;  %v180_v48 = vpop.xlane.xlu2 %179 }
 0x11b   :  { %v194_v26 = vmul.f32 %v172_v25, %v164_v24  ;;  %v168_v27 = vpop.xlane.xlu0 %167 }
 0x11c   :  { %v181_v28 = vmul.f32 %v168_v27, %v164_v24 }
 0x11d   :  { %v195_v29 = vadd.f32 1e-12, %v194_v26 }
 0x11e   :  { %v182_v30 = vadd.f32 1e-12, %v181_v28 }
 0x11f   :  { %281 = vrsqrt.f32 %v195_v29  ;;  %vm202_vm3 = vweird.f32 %v195_v29 }
 0x120   :  { %283 = vrsqrt.f32 %v182_v30  ;;  %vm189_vm5 = vweird.f32 %v182_v30 }
 0x122   :  { %v176_v45 = vpop.xlane.xlu1 %175 }
 0x125   :  { %v282_v31 = vpop.eup %281 }
 0x126   :  { %v284_v32 = vpop.eup %283  ;;  %v197_v33 = vmul.f32 %v282_v31, %v195_v29  ;;  %vm203_vm1 = vweird.f32 %v282_v31 }
 0x127   :  { %v184_v34 = vmul.f32 %v284_v32, %v182_v30  ;;  %vm190_vm2 = vweird.f32 %v284_v32  ;;  %vm204_vm4 = vmor %vm202_vm3, %vm203_vm1 }
 0x128   :  { %v198_v35 = vmul.f32 %v282_v31, %v197_v33  ;;  %vm191_vm6 = vmor %vm189_vm5, %vm190_vm2 }
 0x129   :  { %v185_v36 = vmul.f32 %v284_v32, %v184_v34 }
 0x12a   :  { %v199_v37 = vmul.f32 0.5, %v198_v35 }
 0x12b   :  { %v186_v38 = vmul.f32 0.5, %v185_v36 }
 0x12c   :  { %v200_v39 = vsub.f32 1.5, %v199_v37 }
 0x12d   :  { %v187_v40 = vsub.f32 1.5, %v186_v38 }
 0x12e   :  { %v201_v41 = vmul.f32 %v282_v31, %v200_v39 }
 0x12f   :  { %v188_v42 = vmul.f32 %v284_v32, %v187_v40 }
 0x130   :  { %v205_v43 = vsel %vm204_vm4, %v282_v31, %v201_v41 }
 0x131   :  { %v192_v46 = vsel %vm191_vm6, %v284_v32, %v188_v42  ;;  %v206_v49 = vmul.f32 %v205_v43, %v180_v48 }
 0x132   :  { %v193_v47 = vmul.f32 %v192_v46, %v176_v45 }
 0x134   :  { %v209_v50 = vsub.f32 %v208_v44, %v193_v47 }
 0x136   :  { %v210_v51 = vadd.f32 %v209_v50, %v206_v49 }
 0x138   :  { %v211_v52 = vmax.f32 %v210_v51, 0.0 }
 0x13a   :  { %212 = vxpose.xlu2.b32.start.end [1/1] (short) (narrow) %v211_v52, 8 }
 0x1d3   :  { %v228_v53 = vpop.trf.xlu2 }
 0x1d4   :  { %245 = vst.msk [vmem:[#allocation12] sm:$0x1] %vm244_vm7, %v228_v53 }
 0x1d5   :  { %256 = dma.vmem_to_hbm [thread:$0]  %s252_s22, 16, %s254_s25, [#allocation5]  }
 0x1d6   :  { %435 = dma.done.wait [#allocation5], 16  }
 0x1d7   :  { %436 = vsyncadd [#allocation5], 4294967280 }
 0x1d8   :  { %261 = vsyncpa [#allocation4], 1 }
 0x1d9   :  { %262 = vsyncpa [#allocation7], 1 }
 0x1da   :  { %263 = vsyncpa [#allocation10], 1 }
 0x1db   :  { %264 = vsyncpa [#allocation5], 1 }

</bundles_post_ra>
